<compile_context>
chip_gen: v7x
topology: tpu7x:2x2x1
jax: 0.10.0
libtpu: 0.0.40
codegen_flags: <defaults>
</compile_context>

<pallas_src>
import functools

import jax
import jax.numpy as jnp
from jax.experimental import pallas as pl
from jax.experimental.pallas import tpu as pltpu


def _round_up(x, m):
    return ((x + m - 1) // m) * m


def _make_vpu_kernel(cin, cout):
    """Unrolled VPU path for tiny Cin*Cout (weights/bias as SMEM scalars)."""

    def kernel(w_ref, b_ref, x_ref, o_ref):
        # w_ref: (Cout, Cin) in SMEM, b_ref: (Cout,) in SMEM
        # x_ref: (Cin, tpix) in VMEM, o_ref: (Cout, tpix) in VMEM
        x = x_ref[...]
        rows = []
        for co in range(cout):
            acc = x[0:1, :] * w_ref[co, 0]
            for ci in range(1, cin):
                acc = acc + x[ci:ci + 1, :] * w_ref[co, ci]
            rows.append(acc + b_ref[co])
        o_ref[...] = jnp.concatenate(rows, axis=0).astype(o_ref.dtype)

    return kernel


def _mxu_kernel(w_ref, b_ref, x_ref, o_ref):
    # w_ref: (Cout, Cin), b_ref: (Cout, 1), x_ref: (Cin, tpix)
    # (Cout, Cin) @ (Cin, tpix) -> (Cout, tpix): MXU N dim = pixels (lane-dense)
    acc = jnp.dot(w_ref[...], x_ref[...], preferred_element_type=jnp.float32)
    o_ref[...] = (acc + b_ref[...]).astype(o_ref.dtype)


@functools.partial(jax.jit, static_argnames=("tpix_cap",))
def outconv(x_nchw, weight, bias, *, tpix_cap=2048):
    """1x1 Conv2d forward (PyTorch OutConv).

    Args:
      x_nchw: (N, Cin, H, W) float32
      weight: (Cout, Cin, 1, 1) float32 (PyTorch Conv2d weight layout)
      bias:   (Cout,) float32
    Returns:
      (N, Cout, H, W) float32
    """
    N, Cin, H, W = x_nchw.shape
    Cout = weight.shape[0]
    P = H * W

    # Pixel-minor layout: NCHW -> (N, Cin, P).  Pure reshape, no transpose.
    x = x_nchw.reshape(N, Cin, P)

    # Pick a lane-dense pixel tile: multiple of 128, as large as the cap
    # allows, with minimal padding of the pixel axis.
    P128 = _round_up(P, 128)
    num_tiles = max(1, -(-P128 // tpix_cap))
    tpix = _round_up(-(-P128 // num_tiles), 128)
    P_pad = num_tiles * tpix
    if P_pad != P:
        x = jnp.pad(x, ((0, 0), (0, 0), (0, P_pad - P)))

    w_mat = weight.reshape(Cout, Cin)
    use_vpu = (Cin * Cout) <= 64  # tiny channel counts: skip the MXU

    if use_vpu:
        kernel = _make_vpu_kernel(Cin, Cout)
        w_arg = w_mat
        b_arg = bias
        w_spec = pl.BlockSpec(memory_space=pltpu.MemorySpace.SMEM)
        b_spec = pl.BlockSpec(memory_space=pltpu.MemorySpace.SMEM)
    else:
        kernel = _mxu_kernel
        w_arg = w_mat
        b_arg = bias.reshape(Cout, 1)
        w_spec = pl.BlockSpec((Cout, Cin), lambda n, p: (0, 0))
        b_spec = pl.BlockSpec((Cout, 1), lambda n, p: (0, 0))

    flops = 2 * N * P * Cin * Cout
    bytes_accessed = 4 * (N * P * Cin + N * P * Cout + Cin * Cout + Cout)

    out_pad = pl.pallas_call(
        kernel,
        out_shape=jax.ShapeDtypeStruct((N, Cout, P_pad), x_nchw.dtype),
        grid_spec=pltpu.PrefetchScalarGridSpec(
            num_scalar_prefetch=0,
            grid=(N, num_tiles),
            in_specs=[
                w_spec,
                b_spec,
                # x tile: (Cin, tpix); batch dim squeezed out of the kernel ref.
                pl.BlockSpec((None, Cin, tpix), lambda n, p: (n, 0, p)),
            ],
            # Output tile (Cout, tpix): lane dim = pixels, unmasked stores.
            out_specs=pl.BlockSpec((None, Cout, tpix), lambda n, p: (n, 0, p)),
        ),
        compiler_params=pltpu.CompilerParams(
            dimension_semantics=("parallel", "parallel"),
            vmem_limit_bytes=32 * 1024 * 1024,
        ),
        cost_estimate=pl.CostEstimate(
            flops=flops, transcendentals=0, bytes_accessed=bytes_accessed),
    )(w_arg, b_arg, x)

    out = out_pad[:, :, :P] if P_pad != P else out_pad
    return out.reshape(N, Cout, H, W)


if __name__ == "__main__":
    key = jax.random.PRNGKey(0)
    kx, kw, kb = jax.random.split(key, 3)

    N, Cin, Cout, H, W = 2, 4, 3, 16, 16

    x = jax.random.normal(kx, (N, Cin, H, W), dtype=jnp.float32)
    # Conv2d(kernel_size=1) params: weight (Cout, Cin, 1, 1), bias (Cout,)
    weight = jax.random.normal(kw, (Cout, Cin, 1, 1), dtype=jnp.float32) * 0.1
    bias = jax.random.normal(kb, (Cout,), dtype=jnp.float32) * 0.1

    out = outconv(x, weight, bias)
    out = jax.block_until_ready(out)

    # Reference (plain JAX): 1x1 conv == channel matmul
    ref = jnp.einsum("nchw,oc->nohw", x, weight.reshape(Cout, Cin)) \
        + bias[None, :, None, None]

    assert out.shape == (N, Cout, H, W)
    assert jnp.allclose(out, ref, atol=1e-5, rtol=1e-5), "mismatch vs reference"
    print("KERNEL_OK")
</pallas_src>

<mosaic_0001>
module attributes {stable_mosaic.version = 11 : i64} {
  func.func @kernel(%arg0: i32, %arg1: i32, %arg2: memref<3x4xf32, #tpu.memory_space<smem>>, %arg3: memref<3xf32, #tpu.memory_space<smem>>, %arg4: memref<1x4x256xf32, #tpu.memory_space<vmem>>, %arg5: memref<1x3x256xf32, #tpu.memory_space<vmem>>) attributes {dimension_semantics = [#tpu.dimension_semantics<parallel>, #tpu.dimension_semantics<parallel>], iteration_bounds = array<i64: 2, 1>, scalar_prefetch = 0 : i64, scratch_operands = 0 : i64, tpu.core_type = #tpu.core_type<tc>, window_params = [{transform_indices = @transform_0, window_bounds = array<i64: 3, 4>}, {transform_indices = @transform_1, window_bounds = array<i64: 3>}, {transform_indices = @transform_2, window_bounds = array<i64: 1, 4, 256>}, {transform_indices = @transform_3, window_bounds = array<i64: 1, 3, 256>}]} {
    %c0 = arith.constant 0 : index
    %c0_0 = arith.constant 0 : index
    %c0_1 = arith.constant 0 : index
    %0 = vector.load %arg4[%c0, %c0_0, %c0_1] : memref<1x4x256xf32, #tpu.memory_space<vmem>>, vector<1x4x256xf32>
    %1 = vector.shape_cast %0 : vector<1x4x256xf32> to vector<4x256xf32>
    %2 = vector.extract_strided_slice %1 {offsets = [0, 0], sizes = [1, 256], strides = [1, 1]} : vector<4x256xf32> to vector<1x256xf32>
    %c0_2 = arith.constant 0 : index
    %c0_3 = arith.constant 0 : index
    %3 = memref.load %arg2[%c0_2, %c0_3] : memref<3x4xf32, #tpu.memory_space<smem>>
    %4 = vector.broadcast %3 : f32 to vector<1x256xf32>
    %5 = arith.mulf %2, %4 : vector<1x256xf32>
    %6 = vector.extract_strided_slice %1 {offsets = [1, 0], sizes = [1, 256], strides = [1, 1]} : vector<4x256xf32> to vector<1x256xf32>
    %c0_4 = arith.constant 0 : index
    %c1 = arith.constant 1 : index
    %7 = memref.load %arg2[%c0_4, %c1] : memref<3x4xf32, #tpu.memory_space<smem>>
    %8 = vector.broadcast %7 : f32 to vector<1x256xf32>
    %9 = arith.mulf %6, %8 : vector<1x256xf32>
    %10 = arith.addf %5, %9 : vector<1x256xf32>
    %11 = vector.extract_strided_slice %1 {offsets = [2, 0], sizes = [1, 256], strides = [1, 1]} : vector<4x256xf32> to vector<1x256xf32>
    %c0_5 = arith.constant 0 : index
    %c2 = arith.constant 2 : index
    %12 = memref.load %arg2[%c0_5, %c2] : memref<3x4xf32, #tpu.memory_space<smem>>
    %13 = vector.broadcast %12 : f32 to vector<1x256xf32>
    %14 = arith.mulf %11, %13 : vector<1x256xf32>
    %15 = arith.addf %10, %14 : vector<1x256xf32>
    %16 = vector.extract_strided_slice %1 {offsets = [3, 0], sizes = [1, 256], strides = [1, 1]} : vector<4x256xf32> to vector<1x256xf32>
    %c0_6 = arith.constant 0 : index
    %c3 = arith.constant 3 : index
    %17 = memref.load %arg2[%c0_6, %c3] : memref<3x4xf32, #tpu.memory_space<smem>>
    %18 = vector.broadcast %17 : f32 to vector<1x256xf32>
    %19 = arith.mulf %16, %18 : vector<1x256xf32>
    %20 = arith.addf %15, %19 : vector<1x256xf32>
    %c0_7 = arith.constant 0 : index
    %21 = memref.load %arg3[%c0_7] : memref<3xf32, #tpu.memory_space<smem>>
    %22 = vector.broadcast %21 : f32 to vector<1x256xf32>
    %23 = arith.addf %20, %22 : vector<1x256xf32>
    %24 = vector.extract_strided_slice %1 {offsets = [0, 0], sizes = [1, 256], strides = [1, 1]} : vector<4x256xf32> to vector<1x256xf32>
    %c1_8 = arith.constant 1 : index
    %c0_9 = arith.constant 0 : index
    %25 = memref.load %arg2[%c1_8, %c0_9] : memref<3x4xf32, #tpu.memory_space<smem>>
    %26 = vector.broadcast %25 : f32 to vector<1x256xf32>
    %27 = arith.mulf %24, %26 : vector<1x256xf32>
    %28 = vector.extract_strided_slice %1 {offsets = [1, 0], sizes = [1, 256], strides = [1, 1]} : vector<4x256xf32> to vector<1x256xf32>
    %c1_10 = arith.constant 1 : index
    %c1_11 = arith.constant 1 : index
    %29 = memref.load %arg2[%c1_10, %c1_11] : memref<3x4xf32, #tpu.memory_space<smem>>
    %30 = vector.broadcast %29 : f32 to vector<1x256xf32>
    %31 = arith.mulf %28, %30 : vector<1x256xf32>
    %32 = arith.addf %27, %31 : vector<1x256xf32>
    %33 = vector.extract_strided_slice %1 {offsets = [2, 0], sizes = [1, 256], strides = [1, 1]} : vector<4x256xf32> to vector<1x256xf32>
    %c1_12 = arith.constant 1 : index
    %c2_13 = arith.constant 2 : index
    %34 = memref.load %arg2[%c1_12, %c2_13] : memref<3x4xf32, #tpu.memory_space<smem>>
    %35 = vector.broadcast %34 : f32 to vector<1x256xf32>
    %36 = arith.mulf %33, %35 : vector<1x256xf32>
    %37 = arith.addf %32, %36 : vector<1x256xf32>
    %38 = vector.extract_strided_slice %1 {offsets = [3, 0], sizes = [1, 256], strides = [1, 1]} : vector<4x256xf32> to vector<1x256xf32>
    %c1_14 = arith.constant 1 : index
    %c3_15 = arith.constant 3 : index
    %39 = memref.load %arg2[%c1_14, %c3_15] : memref<3x4xf32, #tpu.memory_space<smem>>
    %40 = vector.broadcast %39 : f32 to vector<1x256xf32>
    %41 = arith.mulf %38, %40 : vector<1x256xf32>
    %42 = arith.addf %37, %41 : vector<1x256xf32>
    %c1_16 = arith.constant 1 : index
    %43 = memref.load %arg3[%c1_16] : memref<3xf32, #tpu.memory_space<smem>>
    %44 = vector.broadcast %43 : f32 to vector<1x256xf32>
    %45 = arith.addf %42, %44 : vector<1x256xf32>
    %46 = vector.extract_strided_slice %1 {offsets = [0, 0], sizes = [1, 256], strides = [1, 1]} : vector<4x256xf32> to vector<1x256xf32>
    %c2_17 = arith.constant 2 : index
    %c0_18 = arith.constant 0 : index
    %47 = memref.load %arg2[%c2_17, %c0_18] : memref<3x4xf32, #tpu.memory_space<smem>>
    %48 = vector.broadcast %47 : f32 to vector<1x256xf32>
    %49 = arith.mulf %46, %48 : vector<1x256xf32>
    %50 = vector.extract_strided_slice %1 {offsets = [1, 0], sizes = [1, 256], strides = [1, 1]} : vector<4x256xf32> to vector<1x256xf32>
    %c2_19 = arith.constant 2 : index
    %c1_20 = arith.constant 1 : index
    %51 = memref.load %arg2[%c2_19, %c1_20] : memref<3x4xf32, #tpu.memory_space<smem>>
    %52 = vector.broadcast %51 : f32 to vector<1x256xf32>
    %53 = arith.mulf %50, %52 : vector<1x256xf32>
    %54 = arith.addf %49, %53 : vector<1x256xf32>
    %55 = vector.extract_strided_slice %1 {offsets = [2, 0], sizes = [1, 256], strides = [1, 1]} : vector<4x256xf32> to vector<1x256xf32>
    %c2_21 = arith.constant 2 : index
    %c2_22 = arith.constant 2 : index
    %56 = memref.load %arg2[%c2_21, %c2_22] : memref<3x4xf32, #tpu.memory_space<smem>>
    %57 = vector.broadcast %56 : f32 to vector<1x256xf32>
    %58 = arith.mulf %55, %57 : vector<1x256xf32>
    %59 = arith.addf %54, %58 : vector<1x256xf32>
    %60 = vector.extract_strided_slice %1 {offsets = [3, 0], sizes = [1, 256], strides = [1, 1]} : vector<4x256xf32> to vector<1x256xf32>
    %c2_23 = arith.constant 2 : index
    %c3_24 = arith.constant 3 : index
    %61 = memref.load %arg2[%c2_23, %c3_24] : memref<3x4xf32, #tpu.memory_space<smem>>
    %62 = vector.broadcast %61 : f32 to vector<1x256xf32>
    %63 = arith.mulf %60, %62 : vector<1x256xf32>
    %64 = arith.addf %59, %63 : vector<1x256xf32>
    %c2_25 = arith.constant 2 : index
    %65 = memref.load %arg3[%c2_25] : memref<3xf32, #tpu.memory_space<smem>>
    %66 = vector.broadcast %65 : f32 to vector<1x256xf32>
    %67 = arith.addf %64, %66 : vector<1x256xf32>
    %68 = tpu.concatenate %23, %45, %67 in 0 : vector<1x256xf32>, vector<1x256xf32>, vector<1x256xf32> -> vector<3x256xf32>
    %c0_26 = arith.constant 0 : index
    %c0_27 = arith.constant 0 : index
    %c0_28 = arith.constant 0 : index
    %69 = vector.load %arg5[%c0_26, %c0_27, %c0_28] : memref<1x3x256xf32, #tpu.memory_space<vmem>>, vector<1x3x256xf32>
    %70 = vector.shape_cast %69 : vector<1x3x256xf32> to vector<3x256xf32>
    %71 = vector.shape_cast %68 : vector<3x256xf32> to vector<1x3x256xf32>
    tpu.vector_store %arg5[%c0_26, %c0_27, %c0_28], %71 {strides = array<i32>} : memref<1x3x256xf32, #tpu.memory_space<vmem>>, vector<1x3x256xf32>,
    return
  }
  func.func @transform_0(%arg0: i32, %arg1: i32) -> (i32, i32) {
    %c0_i32 = arith.constant 0 : i32
    %c0_i32_0 = arith.constant 0 : i32
    %c0_i32_1 = arith.constant 0 : i32
    return %c0_i32, %c0_i32_0 : i32, i32
  }
  func.func @transform_1(%arg0: i32, %arg1: i32) -> i32 {
    %c0_i32 = arith.constant 0 : i32
    %c0_i32_0 = arith.constant 0 : i32
    return %c0_i32 : i32
  }
  func.func @transform_2(%arg0: i32, %arg1: i32) -> (i32, i32, i32) {
    %c0_i32 = arith.constant 0 : i32
    %c0_i32_0 = arith.constant 0 : i32
    return %arg0, %c0_i32, %arg1 : i32, i32, i32
  }
  func.func @transform_3(%arg0: i32, %arg1: i32) -> (i32, i32, i32) {
    %c0_i32 = arith.constant 0 : i32
    %c0_i32_0 = arith.constant 0 : i32
    return %arg0, %c0_i32, %arg1 : i32, i32, i32
  }
}

</mosaic_0001>

<bundles_post_ra>
// kernel: outconv.1
= control target key start
LH: loop header
LB: loop body
LE: loop exit
PB: predicated region body
PF: predicated region fallthrough
CT: control target
= control target key end

     0   :  { %8 = vsyncpa [#allocation3], 0  ;;  %s744_s0 = inlined_call_operand.vmem [shape: f32[3,4], index: 0, kind: input, shape index: {}]   ;;  %s745_s1 = inlined_call_operand.vmem [shape: f32[3], index: 1, kind: input, shape index: {}]   ;;  %s746_s2 = inlined_call_operand.vmem [shape: f32[2,4,256], index: 2, kind: input, shape index: {}]   ;;  %s747_s3 = inlined_call_operand.vmem [shape: f32[2,3,256], index: 3, kind: output, shape index: {}]  }
   0x1   :  { %9 = vsyncpa [#allocation5], 0  ;;  %s649_s12 = smov 0   ;;  %s651_s13 = smov 0  }
   0x2   :  { %s653_s14 = smov 0  }
   0x3 LB: > { %s481_s15 = sadd.s32 4294967295, %s625_s14   ;;  %s27_s16 = sadd.s32 1, %s621_s13  ;;  %s625_s14 = sphi %s653_s14, %s15_s14   ;;  %s621_s13 = sphi %s651_s13, %s757_s13   ;;  %s617_s12 = sphi %s649_s12, %s756_s12  }
   0x4   : > { %p29_p0 = scmp.ge.s32.totalorder %s27_s16, 2  ;;  %p483_p1 = scmp.ge.s32.totalorder %s625_s14, 1 }
   0x5   : > { %p130_p2 = scmp.lt.s32.totalorder %s625_s14, 3  ;;  %p674_p4 = scmp.eq.s32.totalorder %s481_s15, 0 }
   0x6   : > { %s759_s16 = smov (%p29_p0, %s27_s16), 0  ;;  %s143_s21 = sshll.u32 %s744_s0, 4  ;;  %s144_s21 = int_to_ptr.vmem [resolvable:$true] %s143_s21 }
   0x7   : > { %p670_p3 = pnand %p483_p1, %p130_p2  ;;  %s154_s24 = sshll.u32 %s745_s1, 4  ;;  %s155_s24 = int_to_ptr.vmem [resolvable:$true] %s154_s24 }
   0x8   : > { %s752_s18 = scalar_select %p674_p4, 1, 0 }
   0x9   : > { %s751_s17 = scalar_select %p670_p3, 1, 0 }
   0xa   : > { %p528_p5 = pneg %p670_p3  ;;  %s565_s26 = scalar_lea.vmem %s144_s21, 64 }
   0xb   : > { %p566_p7 = scmp.ne.s32.totalorder %s144_s21, %s565_s26  ;;  %p573_p11 = scmp.lt.s32.totalorder %s144_s21, %s144_s21 }
   0xc   : > { %p688_p6 = pnand %p674_p4, %p528_p5  ;;  %p574_p12 = scmp.lt.s32.totalorder %s565_s26, %s565_s26 }
   0xe   : > { %p567_p8 = pneg %p688_p6  ;;  %p575_p13 = por %p574_p12, %p573_p11 }
  0x10   : > { %p568_p9 = pnand %p567_p8, %p566_p7 }
  0x12   : > { %p569_p10 = pneg %p568_p9 }
  0x14   : > { %p576_p0 = pnand %p575_p13, %p569_p10 }
  0x16   : > { %579 = shalt.err (!%p576_p0)
}
  0x17   : > { %s627_s27 = smov [#allocation2]   ;;  %s580_s28 = scalar_lea.vmem %s155_s24, 16 }
  0x18   : > { %531 = dma.vmem_to_smem (!%p688_p6), %s144_s21, 64, %s627_s27, [#allocation3]  }
  0x19   : > { %p581_p1 = scmp.ne.s32.totalorder %s155_s24, %s580_s28  ;;  %p588_p4 = scmp.lt.s32.totalorder %s155_s24, %s155_s24 }
  0x1a   : > { %p589_p3 = scmp.lt.s32.totalorder %s580_s28, %s580_s28 }
  0x1b   : > { %p583_p2 = pnand %p581_p1, %p567_p8 }
  0x1c   : > { %p590_p7 = por %p589_p3, %p588_p4 }
  0x1d   : > { %p584_p5 = pneg %p583_p2 }
  0x1f   : > { %p591_p9 = pnand %p590_p7, %p584_p5 }
  0x21   : > { %594 = shalt.err (!%p591_p9)
}
  0x22   : > { %s628_s29 = smov [#allocation4]   ;;  %p754_p10 = scmp.ne.s32.totalorder %s751_s17, 0 }
  0x23   : > { %534 = dma.vmem_to_smem (!%p688_p6), %s155_s24, 16, %s628_s29, [#allocation5]  }
  0x24   : > { %180 = sbr.rel (%p754_p10) target bundleno = 81 (0x51), region = 32  ;;  %p755_p11 = scmp.ne.s32.totalorder (!%p754_p10), %s752_s18, 0 }
  0x2b   : > { %608 = dma.done.wait (%p755_p11), [#allocation3], 64  }
  0x2c   : > { %610 = vsyncadd (%p755_p11), [#allocation3], 4294967232 }
  0x2d   : > { %612 = dma.done.wait (%p755_p11), [#allocation5], 16  }
  0x2e   : > { %614 = vsyncadd (%p755_p11), [#allocation5], 4294967280 }
  0x2f   : > { %190 = sfence }
  0x30   : > { %p218_p3 = scmp.lt.s32.totalorder %s617_s12, 1  ;;  %s238_s30 = sld [smem:[#allocation2]]  ;;  %v329_v4 = vlaneseq  ;;  %vm361_vm0 = vcmask 1040384   ;;  %vm364_vm1 = vcmask 1041408  }
  0x31   : > { %s494_s4 = sld [smem:[#allocation2 + $0x1]]  ;;  %s496_s5 = sld [smem:[#allocation2 + $0x2]] }
  0x32   : > { %s761_s12 = smov (!%p218_p3, %s617_s12), 1  ;;  %s498_s6 = sld [smem:[#allocation2 + $0x3]]  ;;  %v330_v14 = vshrl.u32 %v329_v4, 7 }
  0x33   : > { %s712_s7 = sld [smem:[#allocation4]]  ;;  %s518_s8 = sshll.u32 %s761_s12, 3 }
  0x34   : > { %s500_s9 = sld [smem:[#allocation2 + $0x80]]  ;;  %s225_s15 = scalar_lea.vmem %s746_s2, %s518_s8  ;;  %v331_v40 = vsub.s32 0, %v330_v14  ;;  %v335_v41 = vsub.s32 4, %v330_v14 }
  0x35   : > { %v237_v0 = vld [vmem:[%s225_s15] sm:$0xff]  ;;  %s501_s17 = sld [smem:[#allocation2 + $0x81]]  ;;  %s503_s18 = sld [smem:[#allocation2 + $0x82]] }
  0x36   : > { %v239_v1 = vstv %s238_s30  ;;  %s505_s19 = sld [smem:[#allocation2 + $0x83]]  ;;  %s508_s20 = sld [smem:[#allocation2 + $0x100]] }
  0x37   : > { %v242_v2 = vstv %s494_s4  ;;  %v250_v3 = vstv %s496_s5  ;;  %v240_v5 = vmul.f32 %v239_v1, %v237_v0  ;;  %s509_s21 = sld [smem:[#allocation2 + $0x101]]  ;;  %s720_s22 = sld [smem:[#allocation2 + $0x102]] }
  0x38   : > { %v243_v6 = vmul.f32 %v242_v2, %v237_v0  ;;  %v251_v7 = vmul.f32 %v250_v3, %v237_v0  ;;  %v258_v8 = vstv %s498_s6  ;;  %s722_s23 = sld [smem:[#allocation2 + $0x103]]  ;;  %s725_s24 = sld [smem:[#allocation4 + $0x1]] }
  0x39   : > { %v259_v11 = vmul.f32 %v258_v8, %v237_v0  ;;  %v266_v13 = vstv %s712_s7  ;;  %s515_s25 = sld [smem:[#allocation4 + $0x2]]  ;;  %s235_s28 = scalar_lea.vmem %s747_s3, %s518_s8 }
  0x3a   : > { %v495_v9 = vrot.slane %v243_v6, 9  ;;  %v497_v10 = vrot.slane %v251_v7, 10  ;;  %v269_v12 = vstv %s500_s9 }
  0x3b   : > { %v499_v16 = vrot.slane %v259_v11, 11  ;;  %v272_v17 = vstv %s501_s17  ;;  %v280_v18 = vstv %s503_s18  ;;  %v270_v19 = vmul.f32 %v269_v12, %v237_v0 }
  0x3c   : > { %v248_v15 = vadd.f32 %v495_v9, %v240_v5  ;;  %v273_v20 = vmul.f32 %v272_v17, %v237_v0  ;;  %v281_v21 = vmul.f32 %v280_v18, %v237_v0  ;;  %v288_v22 = vstv %s505_s19 }
  0x3d   : > { %v289_v24 = vmul.f32 %v288_v22, %v237_v0  ;;  %v299_v25 = vstv %s508_s20  ;;  %v302_v26 = vstv %s509_s21  ;;  %v310_v33 = vstv %s720_s22 }
  0x3e   : > { %v256_v23 = vadd.f32 %v497_v10, %v248_v15  ;;  %v502_v27 = vrot.slane %v273_v20, 9  ;;  %v504_v28 = vrot.slane %v281_v21, 10  ;;  %v300_v29 = vmul.f32 %v299_v25, %v237_v0 }
  0x3f   : > { %v303_v30 = vmul.f32 %v302_v26, %v237_v0  ;;  %v506_v32 = vrot.slane %v289_v24, 11  ;;  %v318_v34 = vstv %s722_s23  ;;  %v311_v37 = vmul.f32 %v310_v33, %v237_v0 }
  0x40   : > { %v264_v31 = vadd.f32 %v499_v16, %v256_v23  ;;  %v278_v35 = vadd.f32 %v502_v27, %v270_v19  ;;  %v319_v38 = vmul.f32 %v318_v34, %v237_v0  ;;  %v296_v46 = vstv %s725_s24 }
  0x41   : > { %v510_v36 = vrot.slane %v303_v30, 9  ;;  %v512_v44 = vrot.slane %v311_v37, 10  ;;  %v326_v49 = vstv %s515_s25 }
  0x42   : > { %v267_v39 = vadd.f32 %v266_v13, %v264_v31  ;;  %v286_v42 = vadd.f32 %v504_v28, %v278_v35  ;;  %v514_v45 = vrot.slane %v319_v38, 11 }
  0x43   : > { %v308_v43 = vadd.f32 %v510_v36, %v300_v29 }
  0x44   : > { %v294_v47 = vadd.f32 %v506_v32, %v286_v42  ;;  %v332_v52 = vrot.slane %v267_v39, %v331_v40  ;;  %v336_v53 = vrot.slane %v267_v39, %v335_v41 }
  0x45   : > { %v316_v48 = vadd.f32 %v512_v44, %v308_v43 }
  0x46   : > { %v297_v50 = vadd.f32 %v296_v46, %v294_v47 }
  0x47   : > { %v324_v51 = vadd.f32 %v514_v45, %v316_v48 }
  0x48   : > { %v343_v55 = vrot.slane %v297_v50, %v331_v40  ;;  %v347_v56 = vrot.slane %v297_v50, %v335_v41 }
  0x49   : > { %v327_v54 = vadd.f32 %v326_v49, %v324_v51 }
  0x4a   : > { %v362_v59 = vsel %vm361_vm0, %v332_v52, %v343_v55  ;;  %v363_v60 = vsel %vm361_vm0, %v336_v53, %v347_v56 }
  0x4b   : > { %v354_v57 = vrot.slane %v327_v54, %v331_v40  ;;  %v358_v58 = vrot.slane %v327_v54, %v335_v41 }
  0x4d   : > { %v365_v61 = vsel %vm364_vm1, %v362_v59, %v354_v57  ;;  %v366_v62 = vsel %vm364_vm1, %v363_v60, %v358_v58 }
  0x4e   : > { %v369_v63 = vcombine.low %v365_v61, %v366_v62 }
  0x50   : > { %371 = vst [vmem:[%s235_s28] sm:$0x77] %v369_v63 }
  0x51 PF: > { %s15_s14 = sadd.s32 1, %s625_s14   ;;  %s756_s12 = smov %s621_s13 }
  0x52   : > { %p12_p4 = scmp.ge.s32.totalorder %s15_s14, 4   ;;  %s757_s13 = smov %s759_s16 }
  0x54   :  { %14 = sbr.rel (!%p12_p4) target bundleno = 3 (0x3), region = 71 }
  0x5b   :  { %402 = vsyncpa [#allocation3], 1 }
  0x5c   :  { %404 = vsyncpa [#allocation3 + $0x1], 1 }
  0x5d   :  { %405 = vsyncpa [#allocation5], 1 }

</bundles_post_ra>
